<compile_context>
chip_gen: v7x
topology: tpu7x:2x2x1
jax: 0.10.0
libtpu: 0.0.40
codegen_flags: <defaults>
</compile_context>

<pallas_src>
import functools

import jax
import jax.numpy as jnp
from jax.experimental import pallas as pl
from jax.experimental.pallas import tpu as pltpu


_LANE = 128
_VMEM_LIMIT = 32 * 1024 * 1024


def _round_up(n: int, m: int) -> int:
    return ((n + m - 1) // m) * m


def _pick_tile(n: int, pref: int) -> int:
    """Largest tile <= pref that divides n (n is a multiple of 128)."""
    t = pref
    while t > n or n % t != 0:
        t //= 2
    return t


# ---------------------------------------------------------------------------
# Kernels
# ---------------------------------------------------------------------------

def _feature_transform_kernel(x_ref, w_ref, d_ref, z_ref):
    """Z = diag(D^-1/2) @ (X @ W); one row-tile per grid step (layer-1 pre-pass)."""
    z = jnp.dot(x_ref[...].astype(jnp.bfloat16), w_ref[...],
                preferred_element_type=jnp.float32)
    z_ref[...] = (z * d_ref[...]).astype(z_ref.dtype)


def _make_agg_kernel(apply_relu: bool, fuse_next: bool):
    """Aggregation:  H = [relu]( D^-1/2 A Z + b ),   Z already = D^-1/2 (H_prev W).

    If fuse_next: the NEXT layer's feature transform is applied in the finalize
    epilogue and the kernel outputs Z_next = D^-1/2 (H @ W_next) in bf16,
    so intermediate H never touches HBM.
    """
    if fuse_next:
        def kernel(a_ref, z_ref, di_ref, b_ref, wn_ref, out_ref, acc_ref):
            k = pl.program_id(1)

            @pl.when(k == 0)
            def _():
                acc_ref[...] = jnp.zeros_like(acc_ref)

            # Single MXU op per grid step (bf16 operands, f32 accumulation).
            acc_ref[...] += jnp.dot(a_ref[...], z_ref[...],
                                    preferred_element_type=jnp.float32)

            @pl.when(k == pl.num_programs(1) - 1)
            def _():
                h = acc_ref[...] * di_ref[...] + b_ref[...]
                if apply_relu:
                    h = jnp.maximum(h, 0.0)
                zn = jnp.dot(h.astype(jnp.bfloat16), wn_ref[...],
                             preferred_element_type=jnp.float32) * di_ref[...]
                out_ref[...] = zn.astype(out_ref.dtype)
        return kernel

    def kernel(a_ref, z_ref, di_ref, b_ref, out_ref, acc_ref):
        k = pl.program_id(1)

        @pl.when(k == 0)
        def _():
            acc_ref[...] = jnp.zeros_like(acc_ref)

        acc_ref[...] += jnp.dot(a_ref[...], z_ref[...],
                                preferred_element_type=jnp.float32)

        @pl.when(k == pl.num_programs(1) - 1)
        def _():
            h = acc_ref[...] * di_ref[...] + b_ref[...]
            if apply_relu:
                h = jnp.maximum(h, 0.0)
            out_ref[...] = h.astype(out_ref.dtype)
    return kernel


def _pool_lin_kernel(pool_ref, h_ref, wl_ref, bl_ref, out_ref, acc_ref):
    """out = (pool @ H) @ W_lin + b_lin, streaming H over the node axis."""
    k = pl.program_id(0)

    @pl.when(k == 0)
    def _():
        acc_ref[...] = jnp.zeros_like(acc_ref)

    acc_ref[...] += jnp.dot(pool_ref[...], h_ref[...].astype(jnp.float32),
                            preferred_element_type=jnp.float32)

    @pl.when(k == pl.num_programs(0) - 1)
    def _():
        out_ref[...] = (jnp.dot(acc_ref[...], wl_ref[...],
                                preferred_element_type=jnp.float32)
                        + bl_ref[...])


# ---------------------------------------------------------------------------
# pallas_call wrappers
# ---------------------------------------------------------------------------

def _row_tile(n_pad: int) -> int:
    # Cap tm at n_pad/2 so the parallel row axis has >= 2 tiles (v7x megacore).
    return _pick_tile(n_pad, min(512, max(n_pad // 2, 64)))


def _feature_transform(x, w, d_inv_sqrt):
    n_pad, f_pad = x.shape
    h_pad = w.shape[1]
    tm = _row_tile(n_pad)
    return pl.pallas_call(
        _feature_transform_kernel,
        out_shape=jax.ShapeDtypeStruct((n_pad, h_pad), jnp.bfloat16),
        grid_spec=pltpu.PrefetchScalarGridSpec(
            num_scalar_prefetch=0,
            grid=(n_pad // tm,),
            in_specs=[
                pl.BlockSpec((tm, f_pad), lambda i: (i, 0)),
                pl.BlockSpec((f_pad, h_pad), lambda i: (0, 0)),
                pl.BlockSpec((tm, 1), lambda i: (i, 0)),
            ],
            out_specs=pl.BlockSpec((tm, h_pad), lambda i: (i, 0)),
        ),
        compiler_params=pltpu.CompilerParams(
            dimension_semantics=("parallel",),
            vmem_limit_bytes=_VMEM_LIMIT),
    )(x, w, d_inv_sqrt)


def _gcn_agg(a_bf16, z, d_inv_sqrt, b, w_next, *, apply_relu):
    n_pad = a_bf16.shape[0]
    h_pad = z.shape[1]
    tm = _row_tile(n_pad)
    tk = _pick_tile(n_pad, 2048)
    grid = (n_pad // tm, n_pad // tk)
    fuse_next = w_next is not None

    in_specs = [
        pl.BlockSpec((tm, tk), lambda i, k: (i, k)),       # A tile (bf16)
        pl.BlockSpec((tk, h_pad), lambda i, k: (k, 0)),    # Z (pre-scaled, bf16)
        pl.BlockSpec((tm, 1), lambda i, k: (i, 0)),        # D^-1/2 (row side only)
        pl.BlockSpec((1, h_pad), lambda i, k: (0, 0)),     # bias (resident)
    ]
    args = [a_bf16, z, d_inv_sqrt, b]
    if fuse_next:
        in_specs.append(pl.BlockSpec((h_pad, h_pad), lambda i, k: (0, 0)))  # W_next
        args.append(w_next)

    flops = 2 * n_pad * n_pad * h_pad + (2 * n_pad * h_pad * h_pad if fuse_next else 0)
    bytes_accessed = (n_pad * n_pad * 2            # A (bf16), read once
                      + 2 * n_pad * h_pad * 2      # Z in + Z_next/H out (bf16)
                      + n_pad * 4 + h_pad * 4
                      + (h_pad * h_pad * 2 if fuse_next else 0))

    return pl.pallas_call(
        _make_agg_kernel(apply_relu, fuse_next),
        out_shape=jax.ShapeDtypeStruct((n_pad, h_pad), jnp.bfloat16),
        grid_spec=pltpu.PrefetchScalarGridSpec(
            num_scalar_prefetch=0,
            grid=grid,
            in_specs=in_specs,
            out_specs=pl.BlockSpec((tm, h_pad), lambda i, k: (i, 0)),
            scratch_shapes=[pltpu.VMEM((tm, h_pad), jnp.float32)],
        ),
        compiler_params=pltpu.CompilerParams(
            dimension_semantics=("parallel", "arbitrary"),
            vmem_limit_bytes=_VMEM_LIMIT),
        cost_estimate=pl.CostEstimate(flops=int(flops), transcendentals=0,
                                      bytes_accessed=int(bytes_accessed)),
    )(*args)


def _pool_and_linear(pool, h, wl, bl):
    num_graphs, n_pad = pool.shape
    h_pad = h.shape[1]
    num_classes = wl.shape[1]
    tk = _pick_tile(n_pad, 4096)   # typically a single grid step
    grid = (n_pad // tk,)

    return pl.pallas_call(
        _pool_lin_kernel,
        out_shape=jax.ShapeDtypeStruct((num_graphs, num_classes), jnp.float32),
        grid_spec=pltpu.PrefetchScalarGridSpec(
            num_scalar_prefetch=0,
            grid=grid,
            in_specs=[
                pl.BlockSpec((num_graphs, tk), lambda k: (0, k)),
                pl.BlockSpec((tk, h_pad), lambda k: (k, 0)),
                pl.BlockSpec((h_pad, num_classes), lambda k: (0, 0)),
                pl.BlockSpec((1, num_classes), lambda k: (0, 0)),
            ],
            out_specs=pl.BlockSpec((num_graphs, num_classes), lambda k: (0, 0)),
            scratch_shapes=[pltpu.VMEM((num_graphs, h_pad), jnp.float32)],
        ),
        compiler_params=pltpu.CompilerParams(
            dimension_semantics=("arbitrary",),
            vmem_limit_bytes=_VMEM_LIMIT),
    )(pool, h, wl, bl)


# ---------------------------------------------------------------------------
# Forward pass (graph -> dense padded tensors is plain-JAX glue)
# ---------------------------------------------------------------------------

def gcn_forward(x, edge_index, batch, params, num_graphs):
    """x: (N, F) float, edge_index: (2, E) int, batch: (N,) int."""
    n_nodes, f_in = x.shape
    n_pad = _round_up(n_nodes, _LANE)

    w1, b1, w2, b2, w3, b3, wl, bl = params
    hidden = w1.shape[1]
    num_classes = wl.shape[1]
    f_pad = _round_up(f_in, _LANE)
    h_pad = _round_up(hidden, _LANE)

    src = edge_index[0].astype(jnp.int32)
    dst = edge_index[1].astype(jnp.int32)

    # Dense adjacency built directly in bf16 (the streamed dtype); scatter-ADD
    # for multigraph parity with PyG gcn_norm, messages flow src -> dst.
    ones_bf16 = jnp.ones_like(src, dtype=jnp.bfloat16)
    a = jnp.zeros((n_pad, n_pad), jnp.bfloat16).at[dst, src].add(ones_bf16)

    # add_remaining_self_loops semantics: only add a self loop where none exists.
    has_self = (jnp.zeros((n_pad,), jnp.float32)
                .at[dst].add(jnp.where(src == dst, 1.0, 0.0))) > 0.0
    node_mask = jnp.arange(n_pad) < n_nodes
    add_loop = jnp.where(node_mask & (~has_self), 1.0, 0.0)
    idx = jnp.arange(n_pad)
    a = a.at[idx, idx].add(add_loop.astype(jnp.bfloat16))

    # Degrees from the edge list (no N^2 reduction); padded rows get deg 0.
    deg = jnp.zeros((n_pad,), jnp.float32).at[dst].add(1.0) + add_loop
    d_inv_sqrt = jnp.where(deg > 0.0,
                           jax.lax.rsqrt(jnp.maximum(deg, 1.0)),
                           0.0).reshape(n_pad, 1).astype(jnp.float32)

    # Zero-pad features / parameters to lane-dense (multiple-of-128) shapes.
    x_p = jnp.zeros((n_pad, f_pad), jnp.float32).at[:n_nodes, :f_in].set(
        x.astype(jnp.float32))

    def pad_mat(m, rows, cols):
        return jnp.zeros((rows, cols), jnp.float32).at[:m.shape[0], :m.shape[1]].set(m)

    w1_p = pad_mat(w1, f_pad, h_pad).astype(jnp.bfloat16)
    w2_p = pad_mat(w2, h_pad, h_pad).astype(jnp.bfloat16)
    w3_p = pad_mat(w3, h_pad, h_pad).astype(jnp.bfloat16)
    wl_p = pad_mat(wl, h_pad, num_classes)                       # f32
    b1_p = pad_mat(b1, 1, h_pad)
    b2_p = pad_mat(b2, 1, h_pad)
    b3_p = pad_mat(b3, 1, h_pad)

    # global_mean_pool matrix (G, Np); padded nodes map to graph id G -> zero weight.
    batch_p = jnp.full((n_pad,), num_graphs, jnp.int32).at[:n_nodes].set(
        batch.astype(jnp.int32))
    onehot = (batch_p[None, :] == jnp.arange(num_graphs)[:, None]).astype(jnp.float32)
    counts = jnp.sum(onehot, axis=1, keepdims=True)
    pool = onehot / jnp.maximum(counts, 1.0)

    # Layer-1 feature transform as a standalone pre-pass (K = f_in is tiny).
    z1 = _feature_transform(x_p, w1_p, d_inv_sqrt)

    # Aggregation layers; layer n's epilogue emits layer n+1's Z directly.
    z2 = _gcn_agg(a, z1, d_inv_sqrt, b1_p, w2_p, apply_relu=True)
    z3 = _gcn_agg(a, z2, d_inv_sqrt, b2_p, w3_p, apply_relu=True)
    h3 = _gcn_agg(a, z3, d_inv_sqrt, b3_p, None, apply_relu=False)

    # F.dropout(p=0.5, training=False) -> identity in eval mode.
    return _pool_and_linear(pool, h3, wl_p, bl)


gcn_forward_jit = functools.partial(jax.jit, static_argnames=("num_graphs",))(gcn_forward)


def init_params(key, num_node_features, hidden_channels, num_classes):
    ks = jax.random.split(key, 4)
    scale = 0.1
    w1 = scale * jax.random.normal(ks[0], (num_node_features, hidden_channels), jnp.float32)
    b1 = jnp.zeros((1, hidden_channels), jnp.float32)
    w2 = scale * jax.random.normal(ks[1], (hidden_channels, hidden_channels), jnp.float32)
    b2 = jnp.zeros((1, hidden_channels), jnp.float32)
    w3 = scale * jax.random.normal(ks[2], (hidden_channels, hidden_channels), jnp.float32)
    b3 = jnp.zeros((1, hidden_channels), jnp.float32)
    wl = scale * jax.random.normal(ks[3], (hidden_channels, num_classes), jnp.float32)
    bl = jnp.zeros((1, num_classes), jnp.float32)
    return (w1, b1, w2, b2, w3, b3, wl, bl)


if __name__ == "__main__":
    key = jax.random.PRNGKey(0)
    k_x, k_e, k_p = jax.random.split(key, 3)

    N = 16                # total nodes across the batch
    F = 4                 # num_node_features
    H = 32                # hidden_channels
    C = 3                 # num_classes
    G = 2                 # graphs in the batch
    E = 24                # number of directed edges

    x = jax.random.normal(k_x, (N, F), jnp.float32)

    # Edges only within each graph: graph 0 owns nodes [0,8), graph 1 owns [8,16).
    e0 = jax.random.randint(k_e, (2, E // 2), 0, N // 2)
    e1 = jax.random.randint(jax.random.fold_in(k_e, 1), (2, E // 2), N // 2, N)
    edge_index = jnp.concatenate([e0, e1], axis=1).astype(jnp.int32)

    batch = jnp.concatenate([jnp.zeros((N // 2,), jnp.int32),
                             jnp.ones((N // 2,), jnp.int32)])

    params = init_params(k_p, F, H, C)

    out = gcn_forward_jit(x, edge_index, batch, params, num_graphs=G)
    out = jax.block_until_ready(out)
    assert out.shape == (G, C), out.shape
    assert bool(jnp.all(jnp.isfinite(out)))
    print("KERNEL_OK")
</pallas_src>

<mosaic_0001>
module attributes {stable_mosaic.version = 11 : i64} {
  func.func @_feature_transform_kernel(%arg0: i32, %arg1: memref<64x128xf32, #tpu.memory_space<vmem>>, %arg2: memref<128x128xbf16, #tpu.memory_space<vmem>>, %arg3: memref<64x1xf32, #tpu.memory_space<vmem>>, %arg4: memref<64x128xbf16, #tpu.memory_space<vmem>>) attributes {dimension_semantics = [#tpu.dimension_semantics<parallel>], iteration_bounds = array<i64: 2>, scalar_prefetch = 0 : i64, scratch_operands = 0 : i64, tpu.core_type = #tpu.core_type<tc>, window_params = [{transform_indices = @transform_0, window_bounds = array<i64: 64, 128>}, {pipeline_mode = #tpu.pipeline_mode<synchronous>, transform_indices = @transform_1, window_bounds = array<i64: 128, 128>}, {transform_indices = @transform_2, window_bounds = array<i64: 64, 1>}, {transform_indices = @transform_3, window_bounds = array<i64: 64, 128>}]} {
    %c0 = arith.constant 0 : index
    %c0_0 = arith.constant 0 : index
    %0 = vector.load %arg1[%c0, %c0_0] : memref<64x128xf32, #tpu.memory_space<vmem>>, vector<64x128xf32>
    %1 = arith.truncf %0 : vector<64x128xf32> to vector<64x128xbf16>
    %c0_1 = arith.constant 0 : index
    %c0_2 = arith.constant 0 : index
    %2 = vector.load %arg2[%c0_1, %c0_2] : memref<128x128xbf16, #tpu.memory_space<vmem>>, vector<128x128xbf16>
    %cst = arith.constant dense<0.000000e+00> : vector<64x128xf32>
    %3 = tpu.matmul %1, %2, %cst {dimension_numbers = #tpu.dot_dimension_numbers<[1], [0], [0], [1], [0, 0, 1, 1], [], []>} : vector<64x128xbf16>, vector<128x128xbf16>, vector<64x128xf32> -> vector<64x128xf32>
    %c0_3 = arith.constant 0 : index
    %c0_4 = arith.constant 0 : index
    %4 = vector.load %arg3[%c0_3, %c0_4] : memref<64x1xf32, #tpu.memory_space<vmem>>, vector<64x1xf32>
    %5 = vector.broadcast %4 : vector<64x1xf32> to vector<64x128xf32>
    %6 = arith.mulf %3, %5 : vector<64x128xf32>
    %7 = arith.truncf %6 : vector<64x128xf32> to vector<64x128xbf16>
    %c0_5 = arith.constant 0 : index
    %c0_6 = arith.constant 0 : index
    %8 = vector.load %arg4[%c0_5, %c0_6] : memref<64x128xbf16, #tpu.memory_space<vmem>>, vector<64x128xbf16>
    tpu.vector_store %arg4[%c0_5, %c0_6], %7 {strides = array<i32>} : memref<64x128xbf16, #tpu.memory_space<vmem>>, vector<64x128xbf16>,
    return
  }
  func.func @transform_0(%arg0: i32) -> (i32, i32) {
    %c0_i32 = arith.constant 0 : i32
    %c0_i32_0 = arith.constant 0 : i32
    return %arg0, %c0_i32 : i32, i32
  }
  func.func @transform_1(%arg0: i32) -> (i32, i32) {
    %c0_i32 = arith.constant 0 : i32
    %c0_i32_0 = arith.constant 0 : i32
    %c0_i32_1 = arith.constant 0 : i32
    return %c0_i32, %c0_i32_0 : i32, i32
  }
  func.func @transform_2(%arg0: i32) -> (i32, i32) {
    %c0_i32 = arith.constant 0 : i32
    %c0_i32_0 = arith.constant 0 : i32
    return %arg0, %c0_i32 : i32, i32
  }
  func.func @transform_3(%arg0: i32) -> (i32, i32) {
    %c0_i32 = arith.constant 0 : i32
    %c0_i32_0 = arith.constant 0 : i32
    return %arg0, %c0_i32 : i32, i32
  }
}

module attributes {stable_mosaic.version = 11 : i64} {
  func.func @kernel(%arg0: i32, %arg1: i32, %arg2: memref<64x128xbf16, #tpu.memory_space<vmem>>, %arg3: memref<128x128xbf16, #tpu.memory_space<vmem>>, %arg4: memref<64x1xf32, #tpu.memory_space<vmem>>, %arg5: memref<1x128xf32, #tpu.memory_space<vmem>>, %arg6: memref<128x128xbf16, #tpu.memory_space<vmem>>, %arg7: memref<64x128xbf16, #tpu.memory_space<vmem>>, %arg8: memref<64x128xf32, #tpu.memory_space<vmem>>) attributes {dimension_semantics = [#tpu.dimension_semantics<parallel>, #tpu.dimension_semantics<arbitrary>], iteration_bounds = array<i64: 2, 1>, scalar_prefetch = 0 : i64, scratch_operands = 1 : i64, tpu.core_type = #tpu.core_type<tc>, window_params = [{transform_indices = @transform_0, window_bounds = array<i64: 64, 128>}, {transform_indices = @transform_1, window_bounds = array<i64: 128, 128>}, {transform_indices = @transform_2, window_bounds = array<i64: 64, 1>}, {pipeline_mode = #tpu.pipeline_mode<synchronous>, transform_indices = @transform_3, window_bounds = array<i64: 1, 128>}, {pipeline_mode = #tpu.pipeline_mode<synchronous>, transform_indices = @transform_4, window_bounds = array<i64: 128, 128>}, {transform_indices = @transform_5, window_bounds = array<i64: 64, 128>}]} {
    %c0_i32 = arith.constant 0 : i32
    %0 = arith.cmpi eq, %arg1, %c0_i32 : i32
    %1 = arith.extui %0 : i1 to i32
    %c0_i32_0 = arith.constant 0 : i32
    %2 = arith.cmpi ne, %1, %c0_i32_0 : i32
    scf.if %2 {
      %cst_10 = arith.constant 0.000000e+00 : f32
      %12 = vector.broadcast %cst_10 : f32 to vector<64x128xf32>
      %c0_11 = arith.constant 0 : index
      %c0_12 = arith.constant 0 : index
      %13 = vector.load %arg8[%c0_11, %c0_12] : memref<64x128xf32, #tpu.memory_space<vmem>>, vector<64x128xf32>
      tpu.vector_store %arg8[%c0_11, %c0_12], %12 {strides = array<i32>} : memref<64x128xf32, #tpu.memory_space<vmem>>, vector<64x128xf32>,
    } else {
    }
    %c0 = arith.constant 0 : index
    %c0_1 = arith.constant 0 : index
    %3 = vector.load %arg8[%c0, %c0_1] : memref<64x128xf32, #tpu.memory_space<vmem>>, vector<64x128xf32>
    %c0_2 = arith.constant 0 : index
    %c0_3 = arith.constant 0 : index
    %4 = vector.load %arg2[%c0_2, %c0_3] : memref<64x128xbf16, #tpu.memory_space<vmem>>, vector<64x128xbf16>
    %c0_4 = arith.constant 0 : index
    %c0_5 = arith.constant 0 : index
    %5 = vector.load %arg3[%c0_4, %c0_5] : memref<128x128xbf16, #tpu.memory_space<vmem>>, vector<128x128xbf16>
    %cst = arith.constant dense<0.000000e+00> : vector<64x128xf32>
    %6 = tpu.matmul %4, %5, %cst {dimension_numbers = #tpu.dot_dimension_numbers<[1], [0], [0], [1], [0, 0, 1, 1], [], []>} : vector<64x128xbf16>, vector<128x128xbf16>, vector<64x128xf32> -> vector<64x128xf32>
    %7 = arith.addf %3, %6 : vector<64x128xf32>
    %c0_6 = arith.constant 0 : index
    %c0_7 = arith.constant 0 : index
    %8 = vector.load %arg8[%c0_6, %c0_7] : memref<64x128xf32, #tpu.memory_space<vmem>>, vector<64x128xf32>
    tpu.vector_store %arg8[%c0_6, %c0_7], %7 {strides = array<i32>} : memref<64x128xf32, #tpu.memory_space<vmem>>, vector<64x128xf32>,
    %c0_i32_8 = arith.constant 0 : i32
    %9 = arith.cmpi eq, %arg1, %c0_i32_8 : i32
    %10 = arith.extui %9 : i1 to i32
    %c0_i32_9 = arith.constant 0 : i32
    %11 = arith.cmpi ne, %10, %c0_i32_9 : i32
    scf.if %11 {
      %c0_10 = arith.constant 0 : index
      %c0_11 = arith.constant 0 : index
      %12 = vector.load %arg8[%c0_10, %c0_11] : memref<64x128xf32, #tpu.memory_space<vmem>>, vector<64x128xf32>
      %c0_12 = arith.constant 0 : index
      %c0_13 = arith.constant 0 : index
      %13 = vector.load %arg4[%c0_12, %c0_13] : memref<64x1xf32, #tpu.memory_space<vmem>>, vector<64x1xf32>
      %14 = vector.broadcast %13 : vector<64x1xf32> to vector<64x128xf32>
      %15 = arith.mulf %12, %14 : vector<64x128xf32>
      %c0_14 = arith.constant 0 : index
      %c0_15 = arith.constant 0 : index
      %16 = vector.load %arg5[%c0_14, %c0_15] : memref<1x128xf32, #tpu.memory_space<vmem>>, vector<1x128xf32>
      %17 = vector.broadcast %16 : vector<1x128xf32> to vector<64x128xf32>
      %18 = arith.addf %15, %17 : vector<64x128xf32>
      %cst_16 = arith.constant 0.000000e+00 : f32
      %19 = vector.broadcast %cst_16 : f32 to vector<64x128xf32>
      %20 = arith.maximumf %18, %19 : vector<64x128xf32>
      %21 = arith.truncf %20 : vector<64x128xf32> to vector<64x128xbf16>
      %c0_17 = arith.constant 0 : index
      %c0_18 = arith.constant 0 : index
      %22 = vector.load %arg6[%c0_17, %c0_18] : memref<128x128xbf16, #tpu.memory_space<vmem>>, vector<128x128xbf16>
      %cst_19 = arith.constant dense<0.000000e+00> : vector<64x128xf32>
      %23 = tpu.matmul %21, %22, %cst_19 {dimension_numbers = #tpu.dot_dimension_numbers<[1], [0], [0], [1], [0, 0, 1, 1], [], []>} : vector<64x128xbf16>, vector<128x128xbf16>, vector<64x128xf32> -> vector<64x128xf32>
      %c0_20 = arith.constant 0 : index
      %c0_21 = arith.constant 0 : index
      %24 = vector.load %arg4[%c0_20, %c0_21] : memref<64x1xf32, #tpu.memory_space<vmem>>, vector<64x1xf32>
      %25 = vector.broadcast %24 : vector<64x1xf32> to vector<64x128xf32>
      %26 = arith.mulf %23, %25 : vector<64x128xf32>
      %27 = arith.truncf %26 : vector<64x128xf32> to vector<64x128xbf16>
      %c0_22 = arith.constant 0 : index
      %c0_23 = arith.constant 0 : index
      %28 = vector.load %arg7[%c0_22, %c0_23] : memref<64x128xbf16, #tpu.memory_space<vmem>>, vector<64x128xbf16>
      tpu.vector_store %arg7[%c0_22, %c0_23], %27 {strides = array<i32>} : memref<64x128xbf16, #tpu.memory_space<vmem>>, vector<64x128xbf16>,
    } else {
    }
    return
  }
  func.func @transform_0(%arg0: i32, %arg1: i32) -> (i32, i32) {
    %c0_i32 = arith.constant 0 : i32
    return %arg0, %arg1 : i32, i32
  }
  func.func @transform_1(%arg0: i32, %arg1: i32) -> (i32, i32) {
    %c0_i32 = arith.constant 0 : i32
    %c0_i32_0 = arith.constant 0 : i32
    return %arg1, %c0_i32 : i32, i32
  }
  func.func @transform_2(%arg0: i32, %arg1: i32) -> (i32, i32) {
    %c0_i32 = arith.constant 0 : i32
    %c0_i32_0 = arith.constant 0 : i32
    return %arg0, %c0_i32 : i32, i32
  }
  func.func @transform_3(%arg0: i32, %arg1: i32) -> (i32, i32) {
    %c0_i32 = arith.constant 0 : i32
    %c0_i32_0 = arith.constant 0 : i32
    %c0_i32_1 = arith.constant 0 : i32
    return %c0_i32, %c0_i32_0 : i32, i32
  }
  func.func @transform_4(%arg0: i32, %arg1: i32) -> (i32, i32) {
    %c0_i32 = arith.constant 0 : i32
    %c0_i32_0 = arith.constant 0 : i32
    %c0_i32_1 = arith.constant 0 : i32
    return %c0_i32, %c0_i32_0 : i32, i32
  }
  func.func @transform_5(%arg0: i32, %arg1: i32) -> (i32, i32) {
    %c0_i32 = arith.constant 0 : i32
    %c0_i32_0 = arith.constant 0 : i32
    return %arg0, %c0_i32 : i32, i32
  }
}

module attributes {stable_mosaic.version = 11 : i64} {
  func.func @kernel(%arg0: i32, %arg1: i32, %arg2: memref<64x128xbf16, #tpu.memory_space<vmem>>, %arg3: memref<128x128xbf16, #tpu.memory_space<vmem>>, %arg4: memref<64x1xf32, #tpu.memory_space<vmem>>, %arg5: memref<1x128xf32, #tpu.memory_space<vmem>>, %arg6: memref<64x128xbf16, #tpu.memory_space<vmem>>, %arg7: memref<64x128xf32, #tpu.memory_space<vmem>>) attributes {dimension_semantics = [#tpu.dimension_semantics<parallel>, #tpu.dimension_semantics<arbitrary>], iteration_bounds = array<i64: 2, 1>, scalar_prefetch = 0 : i64, scratch_operands = 1 : i64, tpu.core_type = #tpu.core_type<tc>, window_params = [{transform_indices = @transform_0, window_bounds = array<i64: 64, 128>}, {transform_indices = @transform_1, window_bounds = array<i64: 128, 128>}, {transform_indices = @transform_2, window_bounds = array<i64: 64, 1>}, {pipeline_mode = #tpu.pipeline_mode<synchronous>, transform_indices = @transform_3, window_bounds = array<i64: 1, 128>}, {transform_indices = @transform_4, window_bounds = array<i64: 64, 128>}]} {
    %c0_i32 = arith.constant 0 : i32
    %0 = arith.cmpi eq, %arg1, %c0_i32 : i32
    %1 = arith.extui %0 : i1 to i32
    %c0_i32_0 = arith.constant 0 : i32
    %2 = arith.cmpi ne, %1, %c0_i32_0 : i32
    scf.if %2 {
      %cst_10 = arith.constant 0.000000e+00 : f32
      %12 = vector.broadcast %cst_10 : f32 to vector<64x128xf32>
      %c0_11 = arith.constant 0 : index
      %c0_12 = arith.constant 0 : index
      %13 = vector.load %arg7[%c0_11, %c0_12] : memref<64x128xf32, #tpu.memory_space<vmem>>, vector<64x128xf32>
      tpu.vector_store %arg7[%c0_11, %c0_12], %12 {strides = array<i32>} : memref<64x128xf32, #tpu.memory_space<vmem>>, vector<64x128xf32>,
    } else {
    }
    %c0 = arith.constant 0 : index
    %c0_1 = arith.constant 0 : index
    %3 = vector.load %arg7[%c0, %c0_1] : memref<64x128xf32, #tpu.memory_space<vmem>>, vector<64x128xf32>
    %c0_2 = arith.constant 0 : index
    %c0_3 = arith.constant 0 : index
    %4 = vector.load %arg2[%c0_2, %c0_3] : memref<64x128xbf16, #tpu.memory_space<vmem>>, vector<64x128xbf16>
    %c0_4 = arith.constant 0 : index
    %c0_5 = arith.constant 0 : index
    %5 = vector.load %arg3[%c0_4, %c0_5] : memref<128x128xbf16, #tpu.memory_space<vmem>>, vector<128x128xbf16>
    %cst = arith.constant dense<0.000000e+00> : vector<64x128xf32>
    %6 = tpu.matmul %4, %5, %cst {dimension_numbers = #tpu.dot_dimension_numbers<[1], [0], [0], [1], [0, 0, 1, 1], [], []>} : vector<64x128xbf16>, vector<128x128xbf16>, vector<64x128xf32> -> vector<64x128xf32>
    %7 = arith.addf %3, %6 : vector<64x128xf32>
    %c0_6 = arith.constant 0 : index
    %c0_7 = arith.constant 0 : index
    %8 = vector.load %arg7[%c0_6, %c0_7] : memref<64x128xf32, #tpu.memory_space<vmem>>, vector<64x128xf32>
    tpu.vector_store %arg7[%c0_6, %c0_7], %7 {strides = array<i32>} : memref<64x128xf32, #tpu.memory_space<vmem>>, vector<64x128xf32>,
    %c0_i32_8 = arith.constant 0 : i32
    %9 = arith.cmpi eq, %arg1, %c0_i32_8 : i32
    %10 = arith.extui %9 : i1 to i32
    %c0_i32_9 = arith.constant 0 : i32
    %11 = arith.cmpi ne, %10, %c0_i32_9 : i32
    scf.if %11 {
      %c0_10 = arith.constant 0 : index
      %c0_11 = arith.constant 0 : index
      %12 = vector.load %arg7[%c0_10, %c0_11] : memref<64x128xf32, #tpu.memory_space<vmem>>, vector<64x128xf32>
      %c0_12 = arith.constant 0 : index
      %c0_13 = arith.constant 0 : index
      %13 = vector.load %arg4[%c0_12, %c0_13] : memref<64x1xf32, #tpu.memory_space<vmem>>, vector<64x1xf32>
      %14 = vector.broadcast %13 : vector<64x1xf32> to vector<64x128xf32>
      %15 = arith.mulf %12, %14 : vector<64x128xf32>
      %c0_14 = arith.constant 0 : index
      %c0_15 = arith.constant 0 : index
      %16 = vector.load %arg5[%c0_14, %c0_15] : memref<1x128xf32, #tpu.memory_space<vmem>>, vector<1x128xf32>
      %17 = vector.broadcast %16 : vector<1x128xf32> to vector<64x128xf32>
      %18 = arith.addf %15, %17 : vector<64x128xf32>
      %19 = arith.truncf %18 : vector<64x128xf32> to vector<64x128xbf16>
      %c0_16 = arith.constant 0 : index
      %c0_17 = arith.constant 0 : index
      %20 = vector.load %arg6[%c0_16, %c0_17] : memref<64x128xbf16, #tpu.memory_space<vmem>>, vector<64x128xbf16>
      tpu.vector_store %arg6[%c0_16, %c0_17], %19 {strides = array<i32>} : memref<64x128xbf16, #tpu.memory_space<vmem>>, vector<64x128xbf16>,
    } else {
    }
    return
  }
  func.func @transform_0(%arg0: i32, %arg1: i32) -> (i32, i32) {
    %c0_i32 = arith.constant 0 : i32
    return %arg0, %arg1 : i32, i32
  }
  func.func @transform_1(%arg0: i32, %arg1: i32) -> (i32, i32) {
    %c0_i32 = arith.constant 0 : i32
    %c0_i32_0 = arith.constant 0 : i32
    return %arg1, %c0_i32 : i32, i32
  }
  func.func @transform_2(%arg0: i32, %arg1: i32) -> (i32, i32) {
    %c0_i32 = arith.constant 0 : i32
    %c0_i32_0 = arith.constant 0 : i32
    return %arg0, %c0_i32 : i32, i32
  }
  func.func @transform_3(%arg0: i32, %arg1: i32) -> (i32, i32) {
    %c0_i32 = arith.constant 0 : i32
    %c0_i32_0 = arith.constant 0 : i32
    %c0_i32_1 = arith.constant 0 : i32
    return %c0_i32, %c0_i32_0 : i32, i32
  }
  func.func @transform_4(%arg0: i32, %arg1: i32) -> (i32, i32) {
    %c0_i32 = arith.constant 0 : i32
    %c0_i32_0 = arith.constant 0 : i32
    return %arg0, %c0_i32 : i32, i32
  }
}

module attributes {stable_mosaic.version = 11 : i64} {
  func.func @_pool_lin_kernel(%arg0: i32, %arg1: memref<2x128xf32, #tpu.memory_space<vmem>>, %arg2: memref<128x128xbf16, #tpu.memory_space<vmem>>, %arg3: memref<128x3xf32, #tpu.memory_space<vmem>>, %arg4: memref<1x3xf32, #tpu.memory_space<vmem>>, %arg5: memref<2x3xf32, #tpu.memory_space<vmem>>, %arg6: memref<2x128xf32, #tpu.memory_space<vmem>>) attributes {dimension_semantics = [#tpu.dimension_semantics<arbitrary>], iteration_bounds = array<i64: 1>, scalar_prefetch = 0 : i64, scratch_operands = 1 : i64, tpu.core_type = #tpu.core_type<tc>, window_params = [{transform_indices = @transform_0, window_bounds = array<i64: 2, 128>}, {transform_indices = @transform_1, window_bounds = array<i64: 128, 128>}, {pipeline_mode = #tpu.pipeline_mode<synchronous>, transform_indices = @transform_2, window_bounds = array<i64: 128, 3>}, {pipeline_mode = #tpu.pipeline_mode<synchronous>, transform_indices = @transform_3, window_bounds = array<i64: 1, 3>}, {pipeline_mode = #tpu.pipeline_mode<synchronous>, transform_indices = @transform_4, window_bounds = array<i64: 2, 3>}]} {
    %c0_i32 = arith.constant 0 : i32
    %0 = arith.cmpi eq, %arg0, %c0_i32 : i32
    %1 = arith.extui %0 : i1 to i32
    %c0_i32_0 = arith.constant 0 : i32
    %2 = arith.cmpi ne, %1, %c0_i32_0 : i32
    scf.if %2 {
      %cst_10 = arith.constant 0.000000e+00 : f32
      %13 = vector.broadcast %cst_10 : f32 to vector<2x128xf32>
      %c0_11 = arith.constant 0 : index
      %c0_12 = arith.constant 0 : index
      %14 = vector.load %arg6[%c0_11, %c0_12] : memref<2x128xf32, #tpu.memory_space<vmem>>, vector<2x128xf32>
      tpu.vector_store %arg6[%c0_11, %c0_12], %13 {strides = array<i32>} : memref<2x128xf32, #tpu.memory_space<vmem>>, vector<2x128xf32>,
    } else {
    }
    %c0 = arith.constant 0 : index
    %c0_1 = arith.constant 0 : index
    %3 = vector.load %arg6[%c0, %c0_1] : memref<2x128xf32, #tpu.memory_space<vmem>>, vector<2x128xf32>
    %c0_2 = arith.constant 0 : index
    %c0_3 = arith.constant 0 : index
    %4 = vector.load %arg1[%c0_2, %c0_3] : memref<2x128xf32, #tpu.memory_space<vmem>>, vector<2x128xf32>
    %c0_4 = arith.constant 0 : index
    %c0_5 = arith.constant 0 : index
    %5 = vector.load %arg2[%c0_4, %c0_5] : memref<128x128xbf16, #tpu.memory_space<vmem>>, vector<128x128xbf16>
    %6 = arith.extf %5 : vector<128x128xbf16> to vector<128x128xf32>
    %cst = arith.constant dense<0.000000e+00> : vector<2x128xf32>
    %7 = tpu.matmul %4, %6, %cst {dimension_numbers = #tpu.dot_dimension_numbers<[1], [0], [0], [1], [0, 0, 1, 1], [], []>} : vector<2x128xf32>, vector<128x128xf32>, vector<2x128xf32> -> vector<2x128xf32>
    %8 = arith.addf %3, %7 : vector<2x128xf32>
    %c0_6 = arith.constant 0 : index
    %c0_7 = arith.constant 0 : index
    %9 = vector.load %arg6[%c0_6, %c0_7] : memref<2x128xf32, #tpu.memory_space<vmem>>, vector<2x128xf32>
    tpu.vector_store %arg6[%c0_6, %c0_7], %8 {strides = array<i32>} : memref<2x128xf32, #tpu.memory_space<vmem>>, vector<2x128xf32>,
    %c0_i32_8 = arith.constant 0 : i32
    %10 = arith.cmpi eq, %arg0, %c0_i32_8 : i32
    %11 = arith.extui %10 : i1 to i32
    %c0_i32_9 = arith.constant 0 : i32
    %12 = arith.cmpi ne, %11, %c0_i32_9 : i32
    scf.if %12 {
      %c0_10 = arith.constant 0 : index
      %c0_11 = arith.constant 0 : index
      %13 = vector.load %arg6[%c0_10, %c0_11] : memref<2x128xf32, #tpu.memory_space<vmem>>, vector<2x128xf32>
      %c0_12 = arith.constant 0 : index
      %c0_13 = arith.constant 0 : index
      %14 = vector.load %arg3[%c0_12, %c0_13] : memref<128x3xf32, #tpu.memory_space<vmem>>, vector<128x3xf32>
      %cst_14 = arith.constant dense<0.000000e+00> : vector<2x3xf32>
      %15 = tpu.matmul %13, %14, %cst_14 {dimension_numbers = #tpu.dot_dimension_numbers<[1], [0], [0], [1], [0, 0, 1, 1], [], []>} : vector<2x128xf32>, vector<128x3xf32>, vector<2x3xf32> -> vector<2x3xf32>
      %c0_15 = arith.constant 0 : index
      %c0_16 = arith.constant 0 : index
      %16 = vector.load %arg4[%c0_15, %c0_16] : memref<1x3xf32, #tpu.memory_space<vmem>>, vector<1x3xf32>
      %17 = vector.broadcast %16 : vector<1x3xf32> to vector<2x3xf32>
      %18 = arith.addf %15, %17 : vector<2x3xf32>
      %c0_17 = arith.constant 0 : index
      %c0_18 = arith.constant 0 : index
      %19 = vector.load %arg5[%c0_17, %c0_18] : memref<2x3xf32, #tpu.memory_space<vmem>>, vector<2x3xf32>
      tpu.vector_store %arg5[%c0_17, %c0_18], %18 {strides = array<i32>} : memref<2x3xf32, #tpu.memory_space<vmem>>, vector<2x3xf32>,
    } else {
    }
    return
  }
  func.func @transform_0(%arg0: i32) -> (i32, i32) {
    %c0_i32 = arith.constant 0 : i32
    %c0_i32_0 = arith.constant 0 : i32
    return %c0_i32, %arg0 : i32, i32
  }
  func.func @transform_1(%arg0: i32) -> (i32, i32) {
    %c0_i32 = arith.constant 0 : i32
    %c0_i32_0 = arith.constant 0 : i32
    return %arg0, %c0_i32 : i32, i32
  }
  func.func @transform_2(%arg0: i32) -> (i32, i32) {
    %c0_i32 = arith.constant 0 : i32
    %c0_i32_0 = arith.constant 0 : i32
    %c0_i32_1 = arith.constant 0 : i32
    return %c0_i32, %c0_i32_0 : i32, i32
  }
  func.func @transform_3(%arg0: i32) -> (i32, i32) {
    %c0_i32 = arith.constant 0 : i32
    %c0_i32_0 = arith.constant 0 : i32
    %c0_i32_1 = arith.constant 0 : i32
    return %c0_i32, %c0_i32_0 : i32, i32
  }
  func.func @transform_4(%arg0: i32) -> (i32, i32) {
    %c0_i32 = arith.constant 0 : i32
    %c0_i32_0 = arith.constant 0 : i32
    %c0_i32_1 = arith.constant 0 : i32
    return %c0_i32, %c0_i32_0 : i32, i32
  }
}

</mosaic_0001>

<bundles_post_ra>
// kernel: gcn_forward.5
= control target key start
LH: loop header
LB: loop body
LE: loop exit
PB: predicated region body
PF: predicated region fallthrough
CT: control target
= control target key end

     0   :  { %s662_s12 = smov 0   ;;  %s730_s0 = inlined_call_operand.vmem [shape: f32[128,128], index: 0, kind: input, shape index: {}]   ;;  %s731_s1 = inlined_call_operand.vmem [shape: bf16[128,128], index: 1, kind: input, shape index: {}]   ;;  %s732_s2 = inlined_call_operand.vmem [shape: f32[128,1], index: 2, kind: input, shape index: {}]   ;;  %s733_s3 = inlined_call_operand.vmem [shape: bf16[128,128], index: 3, kind: output, shape index: {}]  }
   0x1 LB: > { %s502_s13 = sadd.s32 4294967295, %s639_s12   ;;  %p506_p0 = scmp.ge.s32.totalorder %s639_s12, 1  ;;  %s639_s12 = sphi %s662_s12, %s13_s12  }
   0x2   : > { %p149_p1 = scmp.lt.s32.totalorder %s639_s12, 3 }
   0x4   : > { %p150_p2 = pnand %p506_p0, %p149_p1 }
   0x5   : > { %v625_v0 = vld [vmem:[%s731_s1] sm:$0xff] (!%p150_p2)   ;;  %s507_s16 = sshll.u32 (!%p150_p2), %s502_s13, 3  ;;  %v626_v1 = vld [vmem:[%s731_s1 + $0x8] sm:$0xff] (!%p150_p2)   ;;  %v627_v2 = vld [vmem:[%s731_s1 + $0x10] sm:$0xff] (!%p150_p2)   ;;  %v641_v3 = vmov (!%p150_p2), 0  }
   0x6   : > { %153 = sbr.rel (%p150_p2) target bundleno = 260 (0x104), region = 32  ;;  %p179_p3 = scmp.lt.s32.totalorder (!%p150_p2), %s507_s16, 15  ;;  %574 = vmatprep.subr.bf16.mxu0 (!%p150_p2), %v625_v0  ;;  %598 = vmatprep.subr.bf16.mxu1 (!%p150_p2), %v625_v0  ;;  %v628_v4 = vld [vmem:[%s731_s1 + $0x18] sm:$0xff] (!%p150_p2)   ;;  %v629_v13 = vld [vmem:[%s731_s1 + $0x20] sm:$0xff] (!%p150_p2)   ;;  %v630_v16 = vld [vmem:[%s731_s1 + $0x28] sm:$0xff] (!%p150_p2)  }
   0x7   : > { %575 = vmatpush3.bf16.msra.mxu0 (!%p150_p2), %v625_v0  ;;  %606 = vmatpush3.bf16.msra.mxu1 (!%p150_p2), %v625_v0  ;;  %v631_v19 = vld [vmem:[%s731_s1 + $0x30] sm:$0xff] (!%p150_p2)   ;;  %v632_v22 = vld [vmem:[%s731_s1 + $0x38] sm:$0xff] (!%p150_p2)  }
   0x8   : > { %576 = vmatprep.subr.bf16.mxu0 (!%p150_p2), %v626_v1  ;;  %599 = vmatprep.subr.bf16.mxu1 (!%p150_p2), %v626_v1 }
   0x9   : > { %624 = vset.pattern.permute.xlu1 (!%p150_p2), %v641_v3  ;;  %623 = vset.pattern.permute.xlu0 (!%p150_p2), %v641_v3 }
   0xb   : > { %577 = vmatpush3.bf16.msra.mxu0 (!%p150_p2), %v626_v1  ;;  %607 = vmatpush3.bf16.msra.mxu1 (!%p150_p2), %v626_v1 }
   0xc   : > { %578 = vmatprep.subr.bf16.mxu0 (!%p150_p2), %v627_v2  ;;  %600 = vmatprep.subr.bf16.mxu1 (!%p150_p2), %v627_v2 }
   0xd   : > { %s735_s16 = smov (!%p179_p3, %s507_s16), 15 }
   0xe   : > { %s508_s21 = sshll.u32 %s735_s16, 3  ;;  %s512_s11 = sshll.u32 %s735_s16, 2 }
   0xf   : > { %s685_s24 = scalar_lea.vmem %s730_s0, %s508_s21  ;;  %s696_s29 = scalar_lea.vmem %s732_s2, %s508_s21  ;;  %579 = vmatpush3.bf16.msra.mxu0 %v627_v2  ;;  %608 = vmatpush3.bf16.msra.mxu1 %v627_v2 }
  0x10   : > { %v197_v5 = vld [vmem:[%s685_s24] sm:$0xff]  ;;  %v198_v6 = vld [vmem:[%s685_s24 + $0x8] sm:$0xff]  ;;  %v340_v11 = vld [vmem:[%s696_s29 + $0x10] sm:$0xff]  ;;  %580 = vmatprep.subr.bf16.mxu0 %v628_v4  ;;  %601 = vmatprep.subr.bf16.mxu1 %v628_v4  ;;  %s194_s15 = scalar_lea.vmem %s733_s3, %s512_s11 }
  0x11   : > { %v201_v7 = vld [vmem:[%s685_s24 + $0x20] sm:$0xff]  ;;  %v205_v8 = vpack.c.bf16 %v198_v6, %v197_v5  ;;  %v202_v9 = vld [vmem:[%s685_s24 + $0x28] sm:$0xff]  ;;  %358 = vperm.xlu1 %624, %v340_v11   ;;  %v341_v14 = vld [vmem:[%s696_s29 + $0x18] sm:$0xff] }
  0x12   : > { %v207_v10 = vpack.c.bf16 %v202_v9, %v201_v7  ;;  %v338_v12 = vld [vmem:[%s696_s29] sm:$0xff]  ;;  %v339_v15 = vld [vmem:[%s696_s29 + $0x8] sm:$0xff]  ;;  %v345_v20 = vld [vmem:[%s696_s29 + $0x38] sm:$0xff] }
  0x13   : > { %590 = vmatprep.mubr.bf16.mxu0 %v205_v8  ;;  %348 = vperm.xlu0 %623, %v338_v12   ;;  %v343_v17 = vld [vmem:[%s696_s29 + $0x28] sm:$0xff]  ;;  %v342_v18 = vld [vmem:[%s696_s29 + $0x20] sm:$0xff]  ;;  %v344_v21 = vld [vmem:[%s696_s29 + $0x30] sm:$0xff] }
  0x14   : > { %594 = vmatprep.mubr.bf16.mxu1 %v207_v10  ;;  %581 = vmatpush3.bf16.msra.mxu0 %v628_v4  ;;  %v199_v23 = vld [vmem:[%s685_s24 + $0x10] sm:$0xff]  ;;  %v200_v24 = vld [vmem:[%s685_s24 + $0x18] sm:$0xff] }
  0x15   : > { %609 = vmatpush3.bf16.msra.mxu1 %v628_v4  ;;  %582 = vmatprep.subr.bf16.mxu0 %v629_v13  ;;  %v203_v25 = vld [vmem:[%s685_s24 + $0x30] sm:$0xff]  ;;  %v204_v26 = vld [vmem:[%s685_s24 + $0x38] sm:$0xff]  ;;  %v206_v27 = vpack.c.bf16 %v200_v24, %v199_v23 }
  0x16   : > { %602 = vmatprep.subr.bf16.mxu1 %v629_v13  ;;  %363 = vperm.xlu1 %624, %v341_v14   ;;  %v208_v28 = vpack.c.bf16 %v204_v26, %v203_v25 }
  0x17   : > { %353 = vperm.xlu0 %623, %v339_v15  }
  0x18   : > { %583 = vmatpush3.bf16.msra.mxu0 %v629_v13 }
  0x19   : > { %610 = vmatpush3.bf16.msra.mxu1 %v629_v13  ;;  %584 = vmatprep.subr.bf16.mxu0 %v630_v16 }
  0x1a   : > { %603 = vmatprep.subr.bf16.mxu1 %v630_v16  ;;  %373 = vperm.xlu1 %624, %v343_v17  }
  0x1b   : > { %368 = vperm.xlu0 %623, %v342_v18  }
  0x1c   : > { %585 = vmatpush3.bf16.msra.mxu0 %v630_v16 }
  0x1d   : > { %611 = vmatpush3.bf16.msra.mxu1 %v630_v16  ;;  %586 = vmatprep.subr.bf16.mxu0 %v631_v19 }
  0x1e   : > { %604 = vmatprep.subr.bf16.mxu1 %v631_v19  ;;  %383 = vperm.xlu1 %624, %v345_v20  }
  0x1f   : > { %378 = vperm.xlu0 %623, %v344_v21  }
  0x20   : > { %587 = vmatpush3.bf16.msra.mxu0 %v631_v19 }
  0x21   : > { %612 = vmatpush3.bf16.msra.mxu1 %v631_v19  ;;  %588 = vmatprep.subr.bf16.mxu0 %v632_v22 }
  0x22   : > { %605 = vmatprep.subr.bf16.mxu1 %v632_v22 }
  0x24   : > { %589 = vmatpush3.bf16.msra.mxu0 %v632_v22 }
  0x25   : > { %613 = vmatpush3.bf16.msra.mxu1 %v632_v22 }
  0x27   : > { %591 = vmatmul.mubr.bf16.vlgmr.msra.gmra.mrb[0].mxu0 %v206_v27 }
  0x28   : > { %595 = vmatmul.mubr.bf16.vlgmr.msra.gmra.mrb[0].mxu1 %v208_v28 }
  0x90   : > { %v359_v29 = vpop.permute.xlu1 %358 }
  0x92   : > { %v349_v30 = vpop.permute.xlu0 %348 }
  0x95   : > { %v364_v31 = vpop.permute.xlu1 %363 }
  0x96   : > { %v354_v32 = vpop.permute.xlu0 %353 }
  0x99   : > { %v374_v33 = vpop.permute.xlu1 %373 }
  0x9a   : > { %v369_v34 = vpop.permute.xlu0 %368 }
  0x9d   : > { %v384_v35 = vpop.permute.xlu1 %383 }
  0x9e   : > { %v379_v36 = vpop.permute.xlu0 %378 }
  0xfa   : > { %v592_v37 = vpop.f32.mrb[0].mxu0 }
  0xfb   : > { %v596_v38 = vpop.f32.mrb[0].mxu1  ;;  %v307_v39 = vpop.f32.mrb[1].mxu0  ;;  %v388_v43 = vmul.f32 %v592_v37, %v359_v29 }
  0xfc   : > { %v323_v40 = vpop.f32.mrb[1].mxu1  ;;  %v593_v41 = vpop.f32.mrb[2].mxu0  ;;  %v392_v44 = vmul.f32 %v596_v38, %v379_v36  ;;  %v386_v49 = vmul.f32 %v349_v30, %v307_v39 }
  0xfd   : > { %v597_v42 = vpop.f32.mrb[2].mxu1  ;;  %v389_v45 = vmul.f32 %v593_v41, %v364_v31  ;;  %v310_v47 = vpop.f32.mrb[3].mxu0  ;;  %v390_v50 = vmul.f32 %v369_v34, %v323_v40 }
  0xfe   : > { %v393_v46 = vmul.f32 %v597_v42, %v384_v35  ;;  %v326_v48 = vpop.f32.mrb[3].mxu1  ;;  %v387_v51 = vmul.f32 %v354_v32, %v310_v47 }
  0xff   : > { %v391_v52 = vmul.f32 %v374_v33, %v326_v48  ;;  %v547_v53 = vpack.c.bf16 %v389_v45, %v388_v43 }
 0x100   : > { %v557_v54 = vpack.c.bf16 %v393_v46, %v392_v44  ;;  %v542_v55 = vpack.c.bf16 %v387_v51, %v386_v49 }
 0x101   : > { %v552_v56 = vpack.c.bf16 %v391_v52, %v390_v50  ;;  %559 = vst [vmem:[%s194_s15 + $0x8] sm:$0xff] %v547_v53  }
 0x102   : > { %561 = vst [vmem:[%s194_s15 + $0x18] sm:$0xff] %v557_v54   ;;  %543 = vst [vmem:[%s194_s15] sm:$0xff] %v542_v55  }
 0x103   : > { %560 = vst [vmem:[%s194_s15 + $0x10] sm:$0xff] %v552_v56  }
 0x104 PF: > { %s13_s12 = sadd.s32 1, %s639_s12  }
 0x105   : > { %p10_p4 = scmp.ge.s32.totalorder %s13_s12, 4  }
 0x107   :  { %12 = sbr.rel (!%p10_p4) target bundleno = 1 (0x1), region = 65 }

// kernel: gcn_forward.6
= control target key start
LH: loop header
LB: loop body
LE: loop exit
PB: predicated region body
PF: predicated region fallthrough
CT: control target
= control target key end

     0   :  { %s1107_s18 = smov 0   ;;  %s1109_s19 = smov 0   ;;  %s1208_s0 = inlined_call_operand.vmem [shape: bf16[128,128], index: 0, kind: input, shape index: {}]   ;;  %s1209_s1 = inlined_call_operand.vmem [shape: bf16[128,128], index: 1, kind: input, shape index: {}]   ;;  %s1210_s2 = inlined_call_operand.vmem [shape: f32[128,1], index: 2, kind: input, shape index: {}]   ;;  %s1211_s3 = inlined_call_operand.vmem [shape: f32[1,128], index: 3, kind: input, shape index: {}]   ;;  %s1212_s4 = inlined_call_operand.vmem [shape: bf16[128,128], index: 4, kind: input, shape index: {}]   ;;  %s1213_s5 = inlined_call_operand.vmem [shape: bf16[128,128], index: 5, kind: output, shape index: {}]  }
   0x1   :  { %s1111_s20 = smov 0  }
   0x2 LB: > { %s27_s21 = sadd.s32 1, %s1070_s19  ;;  %p864_p0 = scmp.ge.s32.totalorder %s1074_s20, 1  ;;  %s1074_s20 = sphi %s1111_s20, %s15_s20   ;;  %s1070_s19 = sphi %s1109_s19, %s1215_s19   ;;  %s1066_s18 = sphi %s1107_s18, %s1214_s18  }
   0x3   : > { %p29_p1 = scmp.ge.s32.totalorder %s27_s21, 2  ;;  %p227_p2 = scmp.lt.s32.totalorder %s1074_s20, 3 }
   0x5   : > { %s1217_s21 = smov (%p29_p1, %s27_s21), 0  ;;  %p228_p3 = pnand %p864_p0, %p227_p2 }
   0x6   : > { %v1032_v0 = vld [vmem:[%s1209_s1] sm:$0xff] (!%p228_p3)   ;;  %s865_s24 = sshll.u32 (!%p228_p3), %s1066_s18, 3  ;;  %v1033_v1 = vld [vmem:[%s1209_s1 + $0x8] sm:$0xff] (!%p228_p3)   ;;  %v1076_v2 = vmov (!%p228_p3), 0   ;;  %v1034_v3 = vld [vmem:[%s1209_s1 + $0x10] sm:$0xff] (!%p228_p3)  }
   0x7   : > { %231 = sbr.rel (%p228_p3) target bundleno = 491 (0x1eb), region = 40  ;;  %p269_p4 = scmp.lt.s32.totalorder (!%p228_p3), %s865_s24, 15  ;;  %957 = vmatprep.subr.bf16.mxu0 (!%p228_p3), %v1032_v0  ;;  %1030 = vset.pattern.permute.xlu0 (!%p228_p3), %v1076_v2  ;;  %v1035_v4 = vld [vmem:[%s1209_s1 + $0x18] sm:$0xff] (!%p228_p3)   ;;  %v1036_v6 = vld [vmem:[%s1209_s1 + $0x20] sm:$0xff] (!%p228_p3)   ;;  %v1037_v9 = vld [vmem:[%s1209_s1 + $0x28] sm:$0xff] (!%p228_p3)  }
   0x8   : > { %958 = vmatpush3.bf16.msra.mxu0 (!%p228_p3), %v1032_v0  ;;  %1031 = vset.pattern.permute.xlu1 (!%p228_p3), %v1076_v2  ;;  %v1044_v12 = vld [vmem:[%s1212_s4] sm:$0xff] (!%p228_p3)   ;;  %v1045_v13 = vld [vmem:[%s1212_s4 + $0x8] sm:$0xff] (!%p228_p3)   ;;  %v1038_v15 = vld [vmem:[%s1209_s1 + $0x30] sm:$0xff] (!%p228_p3)  }
   0x9   : > { %959 = vmatprep.subr.bf16.mxu0 (!%p228_p3), %v1033_v1  ;;  %981 = vmatprep.subr.bf16.mxu1 (!%p228_p3), %v1044_v12  ;;  %v1046_v17 = vld [vmem:[%s1212_s4 + $0x10] sm:$0xff] (!%p228_p3)   ;;  %v1039_v20 = vld [vmem:[%s1209_s1 + $0x38] sm:$0xff] (!%p228_p3)   ;;  %v1048_v22 = vld [vmem:[%s1212_s4 + $0x20] sm:$0xff] (!%p228_p3)  }
   0xa   : > { %982 = vmatpush3.bf16.msra.mxu1 (!%p228_p3), %v1044_v12  ;;  %v1047_v21 = vld [vmem:[%s1212_s4 + $0x18] sm:$0xff] (!%p228_p3)   ;;  %v1049_v26 = vld [vmem:[%s1212_s4 + $0x28] sm:$0xff] (!%p228_p3)   ;;  %v1050_v27 = vld [vmem:[%s1212_s4 + $0x30] sm:$0xff] (!%p228_p3)  }
   0xb   : > { %983 = vmatprep.subr.bf16.mxu1 (!%p228_p3), %v1045_v13  ;;  %v1051_v28 = vld [vmem:[%s1212_s4 + $0x38] sm:$0xff] (!%p228_p3)   ;;  %v883_v34 = vld [vmem:[%s1211_s3] ss:$0 sm:$0xff] (!%p228_p3) }
   0xc   : > { %960 = vmatpush3.bf16.msra.mxu0 (!%p228_p3), %v1033_v1 }
   0xd   : > { %961 = vmatprep.subr.bf16.mxu0 (!%p228_p3), %v1034_v3 }
   0xe   : > { %s1219_s24 = smov (!%p269_p4, %s865_s24), 15  ;;  %984 = vmatpush3.bf16.msra.mxu1 %v1045_v13 }
   0xf   : > { %s866_s29 = sshll.u32 %s1219_s24, 2  ;;  %s868_s8 = sshll.u32 %s1219_s24, 3  ;;  %985 = vmatprep.subr.bf16.mxu1 %v1046_v17 }
  0x10   : > { %s1142_s7 = scalar_lea.vmem %s1208_s0, %s866_s29  ;;  %s287_s13 = scalar_lea.vmem %s1210_s2, %s868_s8  ;;  %962 = vmatpush3.bf16.msra.mxu0 %v1034_v3 }
  0x11   : > { %v1040_v5 = vld [vmem:[%s1142_s7] sm:$0xff]   ;;  %963 = vmatprep.subr.bf16.mxu0 %v1035_v4  ;;  %v506_v8 = vld [vmem:[%s287_s13 + $0x10] sm:$0xff]  ;;  %v505_v10 = vld [vmem:[%s287_s13 + $0x8] sm:$0xff]  ;;  %s293_s26 = scalar_lea.vmem %s1213_s5, %s866_s29 }
  0x12   : > { %973 = vmatprep.mubr.bf16.mxu0 %v1040_v5  ;;  %v504_v7 = vld [vmem:[%s287_s13] sm:$0xff]  ;;  %524 = vperm.xlu1 %1031, %v506_v8   ;;  %v507_v11 = vld [vmem:[%s287_s13 + $0x18] sm:$0xff]  ;;  %v509_v16 = vld [vmem:[%s287_s13 + $0x28] sm:$0xff] }
  0x13   : > { %514 = vperm.xlu0 %1030, %v504_v7   ;;  %v508_v14 = vld [vmem:[%s287_s13 + $0x20] sm:$0xff]  ;;  %v510_v18 = vld [vmem:[%s287_s13 + $0x30] sm:$0xff]  ;;  %v511_v19 = vld [vmem:[%s287_s13 + $0x38] sm:$0xff]  ;;  %986 = vmatpush3.bf16.msra.mxu1 %v1046_v17 }
  0x14   : > { %964 = vmatpush3.bf16.msra.mxu0 %v1035_v4  ;;  %987 = vmatprep.subr.bf16.mxu1 %v1047_v21  ;;  %v1041_v23 = vld [vmem:[%s1142_s7 + $0x8] sm:$0xff]   ;;  %v1042_v24 = vld [vmem:[%s1142_s7 + $0x10] sm:$0xff]   ;;  %v1043_v25 = vld [vmem:[%s1142_s7 + $0x18] sm:$0xff]  }
  0x15   : > { %965 = vmatprep.subr.bf16.mxu0 %v1036_v6 }
  0x16   : > { %529 = vperm.xlu1 %1031, %v507_v11  }
  0x17   : > { %519 = vperm.xlu0 %1030, %v505_v10   ;;  %988 = vmatpush3.bf16.msra.mxu1 %v1047_v21 }
  0x18   : > { %966 = vmatpush3.bf16.msra.mxu0 %v1036_v6  ;;  %989 = vmatprep.subr.bf16.mxu1 %v1048_v22 }
  0x19   : > { %967 = vmatprep.subr.bf16.mxu0 %v1037_v9 }
  0x1a   : > { %539 = vperm.xlu1 %1031, %v509_v16  }
  0x1b   : > { %534 = vperm.xlu0 %1030, %v508_v14   ;;  %990 = vmatpush3.bf16.msra.mxu1 %v1048_v22 }
  0x1c   : > { %968 = vmatpush3.bf16.msra.mxu0 %v1037_v9  ;;  %991 = vmatprep.subr.bf16.mxu1 %v1049_v26 }
  0x1d   : > { %969 = vmatprep.subr.bf16.mxu0 %v1038_v15 }
  0x1e   : > { %549 = vperm.xlu1 %1031, %v511_v19  }
  0x1f   : > { %544 = vperm.xlu0 %1030, %v510_v18   ;;  %992 = vmatpush3.bf16.msra.mxu1 %v1049_v26 }
  0x20   : > { %970 = vmatpush3.bf16.msra.mxu0 %v1038_v15  ;;  %993 = vmatprep.subr.bf16.mxu1 %v1050_v27 }
  0x21   : > { %971 = vmatprep.subr.bf16.mxu0 %v1039_v20 }
  0x23   : > { %994 = vmatpush3.bf16.msra.mxu1 %v1050_v27 }
  0x24   : > { %972 = vmatpush3.bf16.msra.mxu0 %v1039_v20  ;;  %995 = vmatprep.subr.bf16.mxu1 %v1051_v28 }
  0x27   : > { %974 = vmatmul.mubr.bf16.vlgmr.msra.gmra.mrb[0].mxu0 %v1041_v23  ;;  %996 = vmatpush3.bf16.msra.mxu1 %v1051_v28 }
  0x28   : > { %977 = vmatprep.mubr.bf16.mxu0 %v1042_v24 }
  0x2f   : > { %978 = vmatmul.mubr.bf16.gmra.mrb[4].mxu0 %v1043_v25 }
  0x91   : > { %v525_v30 = vpop.permute.xlu1 %524 }
  0x92   : > { %v515_v29 = vpop.permute.xlu0 %514 }
  0x95   : > { %v530_v32 = vpop.permute.xlu1 %529 }
  0x96   : > { %v520_v31 = vpop.permute.xlu0 %519 }
  0x99   : > { %v540_v43 = vpop.permute.xlu1 %539 }
  0x9a   : > { %v535_v37 = vpop.permute.xlu0 %534 }
  0x9d   : > { %v550_v57 = vpop.permute.xlu1 %549 }
  0x9e   : > { %v545_v50 = vpop.permute.xlu0 %544 }
  0xfa   : > { %v975_v33 = vpop.f32.mrb[0].mxu0 }
  0xfb   : > { %v554_v35 = vmul.f32 %v975_v33, %v525_v30  ;;  %v446_v36 = vpop.f32.mrb[1].mxu0 }
  0xfc   : > { %v552_v38 = vmul.f32 %v515_v29, %v446_v36  ;;  %v976_v39 = vpop.f32.mrb[2].mxu0 }
  0xfd   : > { %v569_v40 = vadd.f32 %v883_v34, %v554_v35  ;;  %v555_v41 = vmul.f32 %v976_v39, %v530_v32  ;;  %v449_v42 = vpop.f32.mrb[3].mxu0 }
  0xfe   : > { %v553_v44 = vmul.f32 %v520_v31, %v449_v42  ;;  %v567_v45 = vadd.f32 %v883_v34, %v552_v38 }
  0xff   : > { %v570_v46 = vadd.f32 %v883_v34, %v555_v41  ;;  %v577_v48 = vmax.f32 %v569_v40, 0.0 }
 0x100   : > { %v568_v47 = vadd.f32 %v883_v34, %v553_v44  ;;  %v575_v52 = vmax.f32 %v567_v45, 0.0 }
 0x101   : > { %v578_v49 = vmax.f32 %v570_v46, 0.0 }
 0x102   : > { %v979_v51 = vpop.f32.mrb[4].mxu0  ;;  %v576_v53 = vmax.f32 %v568_v47, 0.0 }
 0x103   : > { %v558_v54 = vmul.f32 %v979_v51, %v545_v50  ;;  %v462_v55 = vpop.f32.mrb[5].mxu0  ;;  %v584_v56 = vpack.c.bf16 %v578_v49, %v577_v48 }
 0x104   : > { %v556_v58 = vmul.f32 %v535_v37, %v462_v55  ;;  %v980_v59 = vpop.f32.mrb[6].mxu0  ;;  %v583_v60 = vpack.c.bf16 %v576_v53, %v575_v52 }
 0x105   : > { %v573_v61 = vadd.f32 %v883_v34, %v558_v54  ;;  %v559_v62 = vmul.f32 %v980_v59, %v550_v57  ;;  %v465_v63 = vpop.f32.mrb[7].mxu0 }
 0x106   : > { %v571_v0 = vadd.f32 %v883_v34, %v556_v58  ;;  %v557_v1 = vmul.f32 %v540_v43, %v465_v63  ;;  %997 = vmatprep.mubr.bf16.mxu1 %v583_v60 }
 0x107   : > { %v574_v2 = vadd.f32 %v883_v34, %v559_v62  ;;  %998 = vmatmul.mubr.bf16.vlgmr.msra.gmra.mrb[0].mxu1 %v584_v56  ;;  %v581_v4 = vmax.f32 %v573_v61, 0.0 }
 0x108   : > { %v572_v3 = vadd.f32 %v883_v34, %v557_v1  ;;  %v579_v6 = vmax.f32 %v571_v0, 0.0 }
 0x109   : > { %v582_v5 = vmax.f32 %v574_v2, 0.0 }
 0x10a   : > { %v580_v7 = vmax.f32 %v572_v3, 0.0 }
 0x10b   : > { %v586_v8 = vpack.c.bf16 %v582_v5, %v581_v4 }
 0x10c   : > { %v585_v9 = vpack.c.bf16 %v580_v7, %v579_v6 }
 0x10e   : > { %1001 = vmatprep.mubr.bf16.mxu1 %v585_v9 }
 0x10f   : > { %1002 = vmatmul.mubr.bf16.gmra.mrb[4].mxu1 %v586_v8 }
 0x1da   : > { %v999_v10 = vpop.f32.mrb[0].mxu1 }
 0x1db   : > { %v685_v11 = vpop.f32.mrb[1].mxu1  ;;  %v718_v13 = vmul.f32 %v999_v10, %v525_v30 }
 0x1dc   : > { %v1000_v12 = vpop.f32.mrb[2].mxu1  ;;  %v716_v16 = vmul.f32 %v685_v11, %v515_v29 }
 0x1dd   : > { %v719_v14 = vmul.f32 %v1000_v12, %v530_v32  ;;  %v688_v15 = vpop.f32.mrb[3].mxu1 }
 0x1de   : > { %v717_v17 = vmul.f32 %v688_v15, %v520_v31 }
 0x1df   : > { %v918_v18 = vpack.c.bf16 %v719_v14, %v718_v13 }
 0x1e0   : > { %v913_v19 = vpack.c.bf16 %v717_v17, %v716_v16 }
 0x1e1   : > { %930 = vst [vmem:[%s293_s26 + $0x8] sm:$0xff] %v918_v18  }
 0x1e2   : > { %914 = vst [vmem:[%s293_s26] sm:$0xff] %v913_v19   ;;  %v1003_v20 = vpop.f32.mrb[4].mxu1 }
 0x1e3   : > { %v701_v21 = vpop.f32.mrb[5].mxu1  ;;  %v722_v23 = vmul.f32 %v1003_v20, %v545_v50 }
 0x1e4   : > { %v1004_v22 = vpop.f32.mrb[6].mxu1  ;;  %v720_v26 = vmul.f32 %v701_v21, %v535_v37 }
 0x1e5   : > { %v723_v24 = vmul.f32 %v1004_v22, %v550_v57  ;;  %v704_v25 = vpop.f32.mrb[7].mxu1 }
 0x1e6   : > { %v721_v27 = vmul.f32 %v704_v25, %v540_v43 }
 0x1e7   : > { %v928_v28 = vpack.c.bf16 %v723_v24, %v722_v23 }
 0x1e8   : > { %v923_v29 = vpack.c.bf16 %v721_v27, %v720_v26 }
 0x1e9   : > { %932 = vst [vmem:[%s293_s26 + $0x18] sm:$0xff] %v928_v28  }
 0x1ea   : > { %931 = vst [vmem:[%s293_s26 + $0x10] sm:$0xff] %v923_v29  }
 0x1eb PF: > { %s15_s20 = sadd.s32 1, %s1074_s20   ;;  %s1214_s18 = smov %s1070_s19 }
 0x1ec   : > { %p12_p5 = scmp.ge.s32.totalorder %s15_s20, 4   ;;  %s1215_s19 = smov %s1217_s21 }
 0x1ee   :  { %14 = sbr.rel (!%p12_p5) target bundleno = 2 (0x2), region = 84 }

// kernel: gcn_forward.8
= control target key start
LH: loop header
LB: loop body
LE: loop exit
PB: predicated region body
PF: predicated region fallthrough
CT: control target
= control target key end

     0   :  { %s890_s15 = smov 0   ;;  %s892_s16 = smov 0   ;;  %s977_s0 = inlined_call_operand.vmem [shape: bf16[128,128], index: 0, kind: input, shape index: {}]   ;;  %s978_s1 = inlined_call_operand.vmem [shape: bf16[128,128], index: 1, kind: input, shape index: {}]   ;;  %s979_s2 = inlined_call_operand.vmem [shape: f32[128,1], index: 2, kind: input, shape index: {}]   ;;  %s980_s3 = inlined_call_operand.vmem [shape: f32[1,128], index: 3, kind: input, shape index: {}]   ;;  %s981_s4 = inlined_call_operand.vmem [shape: bf16[128,128], index: 4, kind: output, shape index: {}]  }
   0x1   :  { %s894_s17 = smov 0  }
   0x2 LB: > { %s26_s18 = sadd.s32 1, %s858_s16  ;;  %p688_p0 = scmp.ge.s32.totalorder %s862_s17, 1  ;;  %s862_s17 = sphi %s894_s17, %s14_s17   ;;  %s858_s16 = sphi %s892_s16, %s983_s16   ;;  %s854_s15 = sphi %s890_s15, %s982_s15  }
   0x3   : > { %p28_p1 = scmp.ge.s32.totalorder %s26_s18, 2  ;;  %p202_p2 = scmp.lt.s32.totalorder %s862_s17, 3 }
   0x5   : > { %s985_s18 = smov (%p28_p1, %s26_s18), 0  ;;  %p203_p3 = pnand %p688_p0, %p202_p2 }
   0x6   : > { %v828_v0 = vld [vmem:[%s978_s1] sm:$0xff] (!%p203_p3)   ;;  %s689_s21 = sshll.u32 (!%p203_p3), %s854_s15, 3  ;;  %v829_v1 = vld [vmem:[%s978_s1 + $0x8] sm:$0xff] (!%p203_p3)   ;;  %v830_v2 = vld [vmem:[%s978_s1 + $0x10] sm:$0xff] (!%p203_p3)   ;;  %v864_v3 = vmov (!%p203_p3), 0  }
   0x7   : > { %206 = sbr.rel (%p203_p3) target bundleno = 261 (0x105), region = 36  ;;  %p242_p4 = scmp.lt.s32.totalorder (!%p203_p3), %s689_s21, 15  ;;  %761 = vmatprep.subr.bf16.mxu0 (!%p203_p3), %v828_v0  ;;  %785 = vmatprep.subr.bf16.mxu1 (!%p203_p3), %v828_v0  ;;  %v831_v4 = vld [vmem:[%s978_s1 + $0x18] sm:$0xff] (!%p203_p3)   ;;  %v832_v7 = vld [vmem:[%s978_s1 + $0x20] sm:$0xff] (!%p203_p3)   ;;  %v833_v12 = vld [vmem:[%s978_s1 + $0x28] sm:$0xff] (!%p203_p3)  }
   0x8   : > { %762 = vmatpush3.bf16.msra.mxu0 (!%p203_p3), %v828_v0  ;;  %793 = vmatpush3.bf16.msra.mxu1 (!%p203_p3), %v828_v0  ;;  %v834_v15 = vld [vmem:[%s978_s1 + $0x30] sm:$0xff] (!%p203_p3)   ;;  %v835_v18 = vld [vmem:[%s978_s1 + $0x38] sm:$0xff] (!%p203_p3)   ;;  %v707_v35 = vld [vmem:[%s980_s3] ss:$0 sm:$0xff] (!%p203_p3) }
   0x9   : > { %763 = vmatprep.subr.bf16.mxu0 (!%p203_p3), %v829_v1  ;;  %786 = vmatprep.subr.bf16.mxu1 (!%p203_p3), %v829_v1 }
   0xa   : > { %827 = vset.pattern.permute.xlu1 (!%p203_p3), %v864_v3  ;;  %826 = vset.pattern.permute.xlu0 (!%p203_p3), %v864_v3 }
   0xc   : > { %764 = vmatpush3.bf16.msra.mxu0 (!%p203_p3), %v829_v1  ;;  %794 = vmatpush3.bf16.msra.mxu1 (!%p203_p3), %v829_v1 }
   0xd   : > { %765 = vmatprep.subr.bf16.mxu0 (!%p203_p3), %v830_v2  ;;  %787 = vmatprep.subr.bf16.mxu1 (!%p203_p3), %v830_v2 }
   0xe   : > { %s987_s21 = smov (!%p242_p4, %s689_s21), 15 }
   0xf   : > { %s690_s26 = sshll.u32 %s987_s21, 2  ;;  %s692_s30 = sshll.u32 %s987_s21, 3 }
  0x10   : > { %s925_s29 = scalar_lea.vmem %s977_s0, %s690_s26  ;;  %s936_s9 = scalar_lea.vmem %s979_s2, %s692_s30  ;;  %766 = vmatpush3.bf16.msra.mxu0 %v830_v2  ;;  %795 = vmatpush3.bf16.msra.mxu1 %v830_v2 }
  0x11   : > { %v836_v5 = vld [vmem:[%s925_s29] sm:$0xff]   ;;  %v837_v6 = vld [vmem:[%s925_s29 + $0x10] sm:$0xff]   ;;  %767 = vmatprep.subr.bf16.mxu0 %v831_v4  ;;  %788 = vmatprep.subr.bf16.mxu1 %v831_v4  ;;  %v480_v10 = vld [vmem:[%s936_s9 + $0x18] sm:$0xff]  ;;  %s266_s27 = scalar_lea.vmem %s981_s4, %s690_s26 }
  0x12   : > { %777 = vmatprep.mubr.bf16.mxu0 %v836_v5  ;;  %v479_v8 = vld [vmem:[%s936_s9 + $0x10] sm:$0xff]  ;;  %v477_v9 = vld [vmem:[%s936_s9] sm:$0xff]  ;;  %781 = vmatprep.mubr.bf16.mxu1 %v837_v6  ;;  %v478_v11 = vld [vmem:[%s936_s9 + $0x8] sm:$0xff] }
  0x13   : > { %497 = vperm.xlu1 %827, %v479_v8   ;;  %487 = vperm.xlu0 %826, %v477_v9   ;;  %v482_v13 = vld [vmem:[%s936_s9 + $0x28] sm:$0xff]  ;;  %v481_v14 = vld [vmem:[%s936_s9 + $0x20] sm:$0xff]  ;;  %v484_v16 = vld [vmem:[%s936_s9 + $0x38] sm:$0xff] }
  0x14   : > { %768 = vmatpush3.bf16.msra.mxu0 %v831_v4  ;;  %796 = vmatpush3.bf16.msra.mxu1 %v831_v4  ;;  %v483_v17 = vld [vmem:[%s936_s9 + $0x30] sm:$0xff]  ;;  %v838_v19 = vld [vmem:[%s925_s29 + $0x8] sm:$0xff]   ;;  %v839_v20 = vld [vmem:[%s925_s29 + $0x18] sm:$0xff]  }
  0x15   : > { %769 = vmatprep.subr.bf16.mxu0 %v832_v7  ;;  %789 = vmatprep.subr.bf16.mxu1 %v832_v7 }
  0x17   : > { %502 = vperm.xlu1 %827, %v480_v10   ;;  %492 = vperm.xlu0 %826, %v478_v11  }
  0x18   : > { %770 = vmatpush3.bf16.msra.mxu0 %v832_v7  ;;  %797 = vmatpush3.bf16.msra.mxu1 %v832_v7 }
  0x19   : > { %771 = vmatprep.subr.bf16.mxu0 %v833_v12  ;;  %790 = vmatprep.subr.bf16.mxu1 %v833_v12 }
  0x1b   : > { %512 = vperm.xlu1 %827, %v482_v13   ;;  %507 = vperm.xlu0 %826, %v481_v14  }
  0x1c   : > { %772 = vmatpush3.bf16.msra.mxu0 %v833_v12  ;;  %798 = vmatpush3.bf16.msra.mxu1 %v833_v12 }
  0x1d   : > { %773 = vmatprep.subr.bf16.mxu0 %v834_v15  ;;  %791 = vmatprep.subr.bf16.mxu1 %v834_v15 }
  0x1f   : > { %522 = vperm.xlu1 %827, %v484_v16   ;;  %517 = vperm.xlu0 %826, %v483_v17  }
  0x20   : > { %774 = vmatpush3.bf16.msra.mxu0 %v834_v15  ;;  %799 = vmatpush3.bf16.msra.mxu1 %v834_v15 }
  0x21   : > { %775 = vmatprep.subr.bf16.mxu0 %v835_v18  ;;  %792 = vmatprep.subr.bf16.mxu1 %v835_v18 }
  0x24   : > { %776 = vmatpush3.bf16.msra.mxu0 %v835_v18  ;;  %800 = vmatpush3.bf16.msra.mxu1 %v835_v18 }
  0x27   : > { %778 = vmatmul.mubr.bf16.vlgmr.msra.gmra.mrb[0].mxu0 %v838_v19  ;;  %782 = vmatmul.mubr.bf16.vlgmr.msra.gmra.mrb[0].mxu1 %v839_v20 }
  0x92   : > { %v498_v21 = vpop.permute.xlu1 %497  ;;  %v488_v22 = vpop.permute.xlu0 %487 }
  0x96   : > { %v503_v23 = vpop.permute.xlu1 %502  ;;  %v493_v24 = vpop.permute.xlu0 %492 }
  0x9a   : > { %v513_v25 = vpop.permute.xlu1 %512  ;;  %v508_v26 = vpop.permute.xlu0 %507 }
  0x9e   : > { %v523_v27 = vpop.permute.xlu1 %522  ;;  %v518_v28 = vpop.permute.xlu0 %517 }
  0xfa   : > { %v779_v29 = vpop.f32.mrb[0].mxu0  ;;  %v783_v30 = vpop.f32.mrb[0].mxu1 }
  0xfb   : > { %v527_v31 = vmul.f32 %v779_v29, %v498_v21  ;;  %v531_v32 = vmul.f32 %v783_v30, %v518_v28  ;;  %v419_v33 = vpop.f32.mrb[1].mxu0  ;;  %v435_v34 = vpop.f32.mrb[1].mxu1 }
  0xfc   : > { %v525_v36 = vmul.f32 %v488_v22, %v419_v33  ;;  %v529_v37 = vmul.f32 %v508_v26, %v435_v34  ;;  %v780_v38 = vpop.f32.mrb[2].mxu0  ;;  %v784_v39 = vpop.f32.mrb[2].mxu1 }
  0xfd   : > { %v528_v40 = vmul.f32 %v780_v38, %v503_v23  ;;  %v532_v41 = vmul.f32 %v784_v39, %v523_v27  ;;  %v422_v42 = vpop.f32.mrb[3].mxu0  ;;  %v438_v43 = vpop.f32.mrb[3].mxu1  ;;  %v542_v46 = vadd.f32 %v707_v35, %v527_v31  ;;  %v546_v47 = vadd.f32 %v707_v35, %v531_v32 }
  0xfe   : > { %v526_v44 = vmul.f32 %v493_v24, %v422_v42  ;;  %v530_v45 = vmul.f32 %v513_v25, %v438_v43  ;;  %v540_v50 = vadd.f32 %v707_v35, %v525_v36  ;;  %v544_v51 = vadd.f32 %v707_v35, %v529_v37 }
  0xff   : > { %v543_v48 = vadd.f32 %v707_v35, %v528_v40  ;;  %v547_v49 = vadd.f32 %v707_v35, %v532_v41 }
 0x100   : > { %v541_v52 = vadd.f32 %v707_v35, %v526_v44  ;;  %v545_v53 = vadd.f32 %v707_v35, %v530_v45 }
 0x101   : > { %v734_v54 = vpack.c.bf16 %v543_v48, %v542_v46  ;;  %v744_v55 = vpack.c.bf16 %v547_v49, %v546_v47 }
 0x102   : > { %v729_v56 = vpack.c.bf16 %v541_v52, %v540_v50  ;;  %v739_v57 = vpack.c.bf16 %v545_v53, %v544_v51 }
 0x103   : > { %746 = vst [vmem:[%s266_s27 + $0x8] sm:$0xff] %v734_v54   ;;  %748 = vst [vmem:[%s266_s27 + $0x18] sm:$0xff] %v744_v55  }
 0x104   : > { %730 = vst [vmem:[%s266_s27] sm:$0xff] %v729_v56   ;;  %747 = vst [vmem:[%s266_s27 + $0x10] sm:$0xff] %v739_v57  }
 0x105 PF: > { %s14_s17 = sadd.s32 1, %s862_s17   ;;  %s982_s15 = smov %s858_s16 }
 0x106   : > { %p11_p5 = scmp.ge.s32.totalorder %s14_s17, 4   ;;  %s983_s16 = smov %s985_s18 }
 0x108   :  { %13 = sbr.rel (!%p11_p5) target bundleno = 2 (0x2), region = 80 }

// kernel: gcn_forward.9
= control target key start
LH: loop header
LB: loop body
LE: loop exit
PB: predicated region body
PF: predicated region fallthrough
CT: control target
= control target key end

     0   :  { %v462_v1 = vmov 0.0|0.0   ;;  %v463_v2 = vmov 0.0   ;;  %vm464_vm0 = vmmov 0   ;;  %s597_s0 = inlined_call_operand.vmem [shape: f32[2,128], index: 0, kind: input, shape index: {}]   ;;  %s598_s1 = inlined_call_operand.vmem [shape: bf16[128,128], index: 1, kind: input, shape index: {}]   ;;  %s599_s2 = inlined_call_operand.vmem [shape: f32[128,3], index: 2, kind: input, shape index: {}]   ;;  %s600_s3 = inlined_call_operand.vmem [shape: f32[1,3], index: 3, kind: input, shape index: {}]   ;;  %s601_s4 = inlined_call_operand.hbm [shape: f32[2,3], index: 4, kind: output, shape index: {}]  }
   0x1   :  { %v244_v0 = vld [vmem:[%s598_s1] sm:$0xff]   ;;  %386 = vmatprep.subr.bf16.mxu0 %v462_v1  ;;  %22 = vst [vmem:[#allocation2] sm:$0x3] %v463_v2  ;;  %348 = vmatprep.mubr.msk.f32.mxu0 %vm464_vm0, %v463_v2  ;;  %v275_v3 = vld [vmem:[%s598_s1 + $0x8] sm:$0xff]   ;;  %v135_v6 = vld [vmem:[%s599_s2 + $0x10] sm:$0xff] }
   0x2   :  { %388 = vmatpush3.bf16.msra.mxu0 %v244_v0  ;;  %410 = vmatprep.subr.bf16.mxu1 %v462_v1  ;;  %v133_v4 = vld [vmem:[%s599_s2] sm:$0xff]  ;;  %v134_v5 = vld [vmem:[%s599_s2 + $0x8] sm:$0xff]  ;;  %v136_v8 = vld [vmem:[%s599_s2 + $0x18] sm:$0xff] }
   0x3   :  { %389 = vmatprep.subr.bf16.mxu0 %v462_v1  ;;  %383 = vmatprep.mubr.msk.f32.mxu1 %vm464_vm0, %v463_v2  ;;  %v411_v7 = vpack.c.bf16 %v134_v5, %v133_v4  ;;  %v414_v9 = vpack.c.bf16 %v136_v8, %v135_v6 }
   0x5   :  { %412 = vmatpush3.bf16.msra.mxu1 %v411_v7 }
   0x6   :  { %391 = vmatpush3.bf16.msra.mxu0 %v275_v3 }
   0x7   :  { %9 = vsyncpa [#allocation4], 0  ;;  %392 = vmatprep.subr.bf16.mxu0 %v462_v1  ;;  %v276_v10 = vld [vmem:[%s598_s1 + $0x10] sm:$0xff]   ;;  %413 = vmatprep.subr.bf16.mxu1 %v462_v1  ;;  %v137_v11 = vld [vmem:[%s599_s2 + $0x20] sm:$0xff]  ;;  %s465_s13 = smov [#allocation3]   ;;  %vm226_vm1 = vcmask 17408  }
   0x8   :  { %v138_v12 = vld [vmem:[%s599_s2 + $0x28] sm:$0xff]  ;;  %v277_v14 = vld [vmem:[%s598_s1 + $0x18] sm:$0xff]   ;;  %v139_v15 = vld [vmem:[%s599_s2 + $0x30] sm:$0xff]  ;;  %s234_s14 = sshll.u32 %s465_s13, 4  ;;  %s235_s14 = int_to_ptr.vmem [resolvable:$true] %s234_s14 }
   0x9   :  { %415 = vmatpush3.bf16.msra.mxu1 %v414_v9  ;;  %v417_v13 = vpack.c.bf16 %v138_v12, %v137_v11  ;;  %v140_v16 = vld [vmem:[%s599_s2 + $0x38] sm:$0xff]  ;;  %v278_v18 = vld [vmem:[%s598_s1 + $0x20] sm:$0xff]   ;;  %v142_v20 = vld [vmem:[%s599_s2 + $0x48] sm:$0xff]  ;;  %p443_p1 = scmp.lt.s32.totalorder %s235_s14, %s235_s14 }
   0xa   :  { %394 = vmatpush3.bf16.msra.mxu0 %v276_v10  ;;  %416 = vmatprep.subr.bf16.mxu1 %v462_v1  ;;  %v420_v17 = vpack.c.bf16 %v140_v16, %v139_v15  ;;  %v141_v19 = vld [vmem:[%s599_s2 + $0x40] sm:$0xff]  ;;  %v279_v22 = vld [vmem:[%s598_s1 + $0x28] sm:$0xff]   ;;  %v280_v23 = vld [vmem:[%s598_s1 + $0x30] sm:$0xff]  }
   0xb   :  { %395 = vmatprep.subr.bf16.mxu0 %v462_v1  ;;  %v423_v21 = vpack.c.bf16 %v142_v20, %v141_v19  ;;  %v281_v24 = vld [vmem:[%s598_s1 + $0x38] sm:$0xff]   ;;  %v24_v25 = vld [vmem:[%s597_s0] sm:$0x3]  ;;  %v143_v26 = vld [vmem:[%s599_s2 + $0x50] sm:$0xff] }
   0xc   :  { %v144_v27 = vld [vmem:[%s599_s2 + $0x58] sm:$0xff]  ;;  %v145_v29 = vld [vmem:[%s599_s2 + $0x60] sm:$0xff]  ;;  %v146_v30 = vld [vmem:[%s599_s2 + $0x68] sm:$0xff] }
   0xd   :  { %418 = vmatpush3.bf16.msra.mxu1 %v417_v13  ;;  %v426_v28 = vpack.c.bf16 %v144_v27, %v143_v26  ;;  %v429_v31 = vpack.c.bf16 %v146_v30, %v145_v29  ;;  %v147_v32 = vld [vmem:[%s599_s2 + $0x70] sm:$0xff]  ;;  %v148_v33 = vld [vmem:[%s599_s2 + $0x78] sm:$0xff]  ;;  %v23_v35 = vld [vmem:[#allocation2] sm:$0x3]  ;;  %s438_s2 = scalar_lea.vmem %s235_s14, 32 }
   0xe   :  { %397 = vmatpush3.bf16.msra.mxu0 %v277_v14  ;;  %419 = vmatprep.subr.bf16.mxu1 %v462_v1  ;;  %v432_v34 = vpack.c.bf16 %v148_v33, %v147_v32  ;;  %v242_v40 = vld [vmem:[%s600_s3] ss:$0 sm:$0xff]  ;;  %p439_p0 = scmp.ne.s32.totalorder %s235_s14, %s438_s2  ;;  %p444_p2 = scmp.lt.s32.totalorder %s438_s2, %s438_s2 }
   0xf   :  { %398 = vmatprep.subr.bf16.mxu0 %v462_v1 }
  0x10   :  { %p445_p3 = por %p444_p2, %p443_p1 }
  0x11   :  { %421 = vmatpush3.bf16.msra.mxu1 %v420_v17 }
  0x12   :  { %400 = vmatpush3.bf16.msra.mxu0 %v278_v18  ;;  %422 = vmatprep.subr.bf16.mxu1 %v462_v1  ;;  %p446_p4 = pnand %p445_p3, %p439_p0 }
  0x13   :  { %401 = vmatprep.subr.bf16.mxu0 %v462_v1 }
  0x15   :  { %424 = vmatpush3.bf16.msra.mxu1 %v423_v21 }
  0x16   :  { %403 = vmatpush3.bf16.msra.mxu0 %v279_v22  ;;  %425 = vmatprep.subr.bf16.mxu1 %v462_v1 }
  0x17   :  { %404 = vmatprep.subr.bf16.mxu0 %v462_v1 }
  0x19   :  { %427 = vmatpush3.bf16.msra.mxu1 %v426_v28 }
  0x1a   :  { %406 = vmatpush3.bf16.msra.mxu0 %v280_v23  ;;  %428 = vmatprep.subr.bf16.mxu1 %v462_v1 }
  0x1b   :  { %407 = vmatprep.subr.bf16.mxu0 %v462_v1 }
  0x1d   :  { %430 = vmatpush3.bf16.msra.mxu1 %v429_v31 }
  0x1e   :  { %409 = vmatpush3.bf16.msra.mxu0 %v281_v24  ;;  %431 = vmatprep.subr.bf16.mxu1 %v462_v1 }
  0x21   :  { %349 = vmatmul.mubr.f32.vlgmr.msra.gmra.mrb[0].mxu0 %v24_v25  ;;  %433 = vmatpush3.bf16.msra.mxu1 %v432_v34 }
  0xf4   :  { %v123_v36 = vpop.f32.mrb[0].mxu0 }
  0xf5   :  { %v127_v37 = vadd.f32 %v123_v36, %v23_v35  ;;  %v350_v38 = vpop.f32.mrb[1].mxu0 }
  0xf7   :  { %128 = vst [vmem:[#allocation2] sm:$0x3] %v127_v37 }
  0xfe   :  { %v132_v39 = vld [vmem:[#allocation2] sm:$0x3] }
  0xff   :  { %384 = vmatmul.mubr.f32.vlgmr.msra.gmra.mrb[0].mxu1 %v132_v39 }
 0x1d2   :  { %v222_v41 = vpop.f32.mrb[0].mxu1 }
 0x1d3   :  { %v223_v42 = vadd.f32 %v242_v40, %v222_v41  ;;  %v385_v43 = vpop.f32.mrb[1].mxu1 }
 0x1d5   :  { %227 = vst.msk [vmem:[#allocation3] sm:$0x3] %vm226_vm1, %v223_v42 }
 0x1d6   :  { %449 = shalt.err (!%p446_p4)
}
 0x1d7   :  { %s450_s17 = scalar_lea.hbm %s601_s4, 32 }
 0x1d8   :  { %p451_p5 = scmp.ne.s32.totalorder %s601_s4, %s450_s17  ;;  %p454_p6 = scmp.lt.u32.totalorder %s450_s17, %s601_s4 }
 0x1da   :  { %p456_p7 = pnand %p454_p6, %p451_p5 }
 0x1dc   :  { %459 = shalt.err (!%p456_p7)
}
 0x1dd   :  { %237 = dma.vmem_to_hbm [thread:$0]  %s235_s14, 32, %s601_s4, [#allocation4]  }
 0x1de   :  { %460 = dma.done.wait [#allocation4], 32  }
 0x1df   :  { %461 = vsyncadd [#allocation4], 4294967264 }
 0x1e0   :  { %241 = vsyncpa [#allocation4], 1 }

</bundles_post_ra>
